<compile_context>
chip_gen: v7x
topology: tpu7x:2x2x1
jax: 0.10.0
libtpu: 0.0.40
codegen_flags: <defaults>
</compile_context>

<pallas_src>
import numpy as np
import jax
import jax.numpy as jnp
from jax.experimental import pallas as pl
from jax.experimental.pallas import tpu as pltpu


def sinusoidal_embedding(n_channels: int, dim: int) -> np.ndarray:
    """Exact reproduction of the PyTorch helper, including the fact that the
    sin/cos slicing `pe[:, 0::2]` operates over the *position* axis (pe has
    already been unsqueezed to (1, n_channels, dim))."""
    p = np.arange(n_channels, dtype=np.float32)[:, None]          # (P, 1)
    i = np.arange(dim, dtype=np.float32)[None, :]                 # (1, D)
    pe = p / np.power(10000.0, 2.0 * np.floor(i / 2.0) / dim)     # (P, D)
    pe = pe[None, :, :].copy()                                    # (1, P, D)
    pe[:, 0::2] = np.sin(pe[:, 0::2])   # even *positions* -> sin
    pe[:, 1::2] = np.cos(pe[:, 1::2])   # odd  *positions* -> cos
    return pe.astype(np.float32)


def _add_pe_kernel(x_ref, pe_ref, o_ref):
    # x_ref / o_ref: (1, Rt, C); pe_ref: (Rt, C).  Lane-dense elementwise add.
    o_ref[...] = x_ref[...] + pe_ref[...][None, :, :]


def _lane_dense_layout(n_feat: int, itemsize: int, target_block_bytes: int = 2 << 20):
    """Pick (R, C, Rt): C a multiple of 128 with R * C == n_feat, and a row
    tile Rt that is a multiple of 8 (or the full R), keeping each block at or
    below ~2 MiB so double-buffered VMEM use stays small on every TPU gen."""
    for c in (2048, 1024, 512, 256, 128):
        if n_feat % c:
            continue
        r = n_feat // c
        max_rows = max(1, target_block_bytes // (c * itemsize))
        if r <= max_rows:
            return r, c, r
        rt = (max_rows // 8) * 8
        while rt >= 8:
            if r % rt == 0:
                return r, c, rt
            rt -= 8
    return None


def positional_encoding_forward(x: jax.Array, pos_embedding: jax.Array,
                                *, force_kernel: bool = False) -> jax.Array:
    """x: (B, F, P, D); pos_embedding: (1, F, P, D)."""
    B, F, P, D = x.shape
    assert pos_embedding.shape == (1, F, P, D)
    pe = pos_embedding.astype(x.dtype)
    n_feat = F * P * D
    itemsize = jnp.dtype(x.dtype).itemsize

    # Small-input bypass: pallas_call launch + per-step overhead dwarfs a
    # KiB-scale elementwise add; XLA fuses the plain add for free.
    if not force_kernel and B * n_feat * itemsize < (1 << 20):
        return x + pe

    layout = _lane_dense_layout(n_feat, itemsize)
    if layout is None:
        # TODO(synk): pad-to-128 path for F*P*D not divisible by 128; fall back
        # to a plain XLA add (still correct, just not a Pallas kernel).
        return x + pe
    R, C, Rt = layout

    x3 = x.reshape(B, R, C)          # (B, R, C) lane-dense view
    pe2 = pe.reshape(R, C)           # (R, C), broadcast over B inside the grid
    grid = (R // Rt, B)              # B innermost: PE tile fetched once per row tile

    out3 = pl.pallas_call(
        _add_pe_kernel,
        out_shape=jax.ShapeDtypeStruct((B, R, C), x.dtype),
        grid=grid,
        in_specs=[
            pl.BlockSpec((1, Rt, C), lambda r, b: (b, r, 0)),   # x
            pl.BlockSpec((Rt, C), lambda r, b: (r, 0)),         # pe (b-invariant)
        ],
        out_specs=pl.BlockSpec((1, Rt, C), lambda r, b: (b, r, 0)),
        input_output_aliases={0: 0},   # reuse x's (reshaped) HBM buffer for out
        compiler_params=pltpu.CompilerParams(
            dimension_semantics=("parallel", "parallel")),
        cost_estimate=pl.CostEstimate(
            flops=B * n_feat,
            transcendentals=0,
            bytes_accessed=(2 * B * n_feat + n_feat) * itemsize),
    )(x3, pe2)
    return out3.reshape(B, F, P, D)


class PositionalEncodingPallas:
    """Mirrors the PyTorch module: fixed (non-trainable) sinusoidal table."""

    def __init__(self, num_frames: int, num_patches: int, d_model: int):
        pe = sinusoidal_embedding(num_frames * num_patches, d_model)  # (1, F*P, D)
        self.pos_embedding = jnp.asarray(
            pe.reshape(1, num_frames, num_patches, d_model))

    def __call__(self, x: jax.Array, *, force_kernel: bool = False) -> jax.Array:
        return positional_encoding_forward(x, self.pos_embedding,
                                           force_kernel=force_kernel)


if __name__ == "__main__":
    # Small shapes consistent with the forward: x is (B, num_frames, num_patches, d_model)
    B, F, P, D = 2, 4, 8, 32
    key = jax.random.PRNGKey(0)
    x = jax.random.normal(key, (B, F, P, D), dtype=jnp.float32)

    module = PositionalEncodingPallas(num_frames=F, num_patches=P, d_model=D)

    # Reference computed BEFORE the kernel (the kernel aliases/donates its
    # reshaped input buffer).
    ref = x + module.pos_embedding

    out = module(x, force_kernel=True)   # force the Pallas path at this tiny size
    out = jax.block_until_ready(out)

    assert out.shape == (B, F, P, D)
    np.testing.assert_allclose(np.asarray(out), np.asarray(ref), rtol=1e-6, atol=1e-6)

    print("KERNEL_OK")
</pallas_src>

<mosaic_0001>
module attributes {stable_mosaic.version = 11 : i64} {
  func.func @_add_pe_kernel(%arg0: i32, %arg1: i32, %arg2: memref<1x1x1024xf32, #tpu.memory_space<vmem>>, %arg3: memref<1x1024xf32, #tpu.memory_space<vmem>>, %arg4: memref<1x1x1024xf32, #tpu.memory_space<vmem>>) attributes {dimension_semantics = [#tpu.dimension_semantics<parallel>, #tpu.dimension_semantics<parallel>], iteration_bounds = array<i64: 1, 2>, scalar_prefetch = 0 : i64, scratch_operands = 0 : i64, tpu.core_type = #tpu.core_type<tc>, window_params = [{transform_indices = @transform_0, window_bounds = array<i64: 1, 1, 1024>}, {transform_indices = @transform_1, window_bounds = array<i64: 1, 1024>}, {transform_indices = @transform_2, window_bounds = array<i64: 1, 1, 1024>}]} {
    %c0 = arith.constant 0 : index
    %c0_0 = arith.constant 0 : index
    %c0_1 = arith.constant 0 : index
    %0 = vector.load %arg2[%c0, %c0_0, %c0_1] : memref<1x1x1024xf32, #tpu.memory_space<vmem>>, vector<1x1x1024xf32>
    %c0_2 = arith.constant 0 : index
    %c0_3 = arith.constant 0 : index
    %1 = vector.load %arg3[%c0_2, %c0_3] : memref<1x1024xf32, #tpu.memory_space<vmem>>, vector<1x1024xf32>
    %2 = vector.shape_cast %1 : vector<1x1024xf32> to vector<1x1x1024xf32>
    %3 = arith.addf %0, %2 : vector<1x1x1024xf32>
    %c0_4 = arith.constant 0 : index
    %c0_5 = arith.constant 0 : index
    %c0_6 = arith.constant 0 : index
    %4 = vector.load %arg4[%c0_4, %c0_5, %c0_6] : memref<1x1x1024xf32, #tpu.memory_space<vmem>>, vector<1x1x1024xf32>
    tpu.vector_store %arg4[%c0_4, %c0_5, %c0_6], %3 {strides = array<i32>} : memref<1x1x1024xf32, #tpu.memory_space<vmem>>, vector<1x1x1024xf32>,
    return
  }
  func.func @transform_0(%arg0: i32, %arg1: i32) -> (i32, i32, i32) {
    %c0_i32 = arith.constant 0 : i32
    %c0_i32_0 = arith.constant 0 : i32
    return %arg1, %arg0, %c0_i32 : i32, i32, i32
  }
  func.func @transform_1(%arg0: i32, %arg1: i32) -> (i32, i32) {
    %c0_i32 = arith.constant 0 : i32
    %c0_i32_0 = arith.constant 0 : i32
    return %arg0, %c0_i32 : i32, i32
  }
  func.func @transform_2(%arg0: i32, %arg1: i32) -> (i32, i32, i32) {
    %c0_i32 = arith.constant 0 : i32
    %c0_i32_0 = arith.constant 0 : i32
    return %arg1, %arg0, %c0_i32 : i32, i32, i32
  }
}

</mosaic_0001>

<bundles_post_ra>
// kernel: tpu_custom_call.1
= control target key start
LH: loop header
LB: loop body
LE: loop exit
PB: predicated region body
PF: predicated region fallthrough
CT: control target
= control target key end

     0   :  { %7 = vsyncpa [#allocation3], 0  ;;  %s701_s0 = inlined_call_operand.hbm [shape: f32[2,1,1024], index: 0, kind: input, shape index: {}, may-alias: {0,2}]   ;;  %s702_s1 = inlined_call_operand.vmem [shape: f32[1,1024], index: 1, kind: input, shape index: {}]   ;;  %s703_s2 = inlined_call_operand.hbm [shape: f32[2,1,1024], index: 2, kind: output, shape index: {}, may-alias: {0,2}]  }
   0x1   :  { %9 = vsyncpa [#allocation3 + $0x1], 0 }
   0x2   :  { %10 = vsyncpa [#allocation4], 0 }
   0x3   :  { %12 = vsyncpa [#allocation4 + $0x1], 0  ;;  %s526_s9 = smov 0   ;;  %s528_s10 = smov 0  }
   0x4   :  { %s530_s11 = smov 0   ;;  %s532_s12 = smov 0  }
   0x5   :  { %s534_s13 = smov 0   ;;  %s536_s14 = smov 0  }
   0x6 LB: > { %s315_s15 = sadd.s32 4294967295, %s507_s14   ;;  %s316_s16 = sadd.s32 4294967294, %s507_s14   ;;  %s507_s14 = sphi %s536_s14, %s18_s14   ;;  %s503_s13 = sphi %s534_s13, %s719_s13   ;;  %s499_s12 = sphi %s532_s12, %s718_s12   ;;  %s495_s11 = sphi %s530_s11, %s717_s11   ;;  %s491_s10 = sphi %s528_s10, %s716_s10   ;;  %s487_s9 = sphi %s526_s9, %s715_s9  }
   0x7   : > { %s27_s17 = sadd.s32 1, %s503_s13  ;;  %s39_s18 = sadd.s32 1, %s495_s11 }
   0x8   : > { %p28_p0 = scmp.ge.s32.totalorder %s27_s17, 2  ;;  %p46_p1 = scmp.ne.s32.totalorder %s495_s11, %s491_s10 }
   0x9   : > { %p47_p2 = scmp.eq.s32.totalorder %s507_s14, 0  ;;  %p52_p3 = scmp.ne.s32.totalorder %s491_s10, %s487_s9 }
   0xa   : > { %s721_s17 = smov (%p28_p0, %s27_s17), 0  ;;  %p53_p5 = scmp.eq.s32.totalorder %s315_s15, 0 }
   0xb   : > { %p567_p4 = por %p47_p2, %p46_p1  ;;  %s34_s20 = ssub.s32 %s503_s13, %s721_s17 }
   0xc   : > { %p104_p6 = scmp.eq.s32.totalorder %s315_s15, 1  ;;  %p37_p7 = scmp.eq.s32.totalorder %s34_s20, 0 }
   0xd   : > { %p573_p8 = por %p53_p5, %p52_p3  ;;  %p110_p10 = scmp.eq.s32.totalorder %s316_s16, 1 }
   0xe   : > { %p577_p9 = por %p104_p6, %p46_p1  ;;  %p345_p13 = scmp.lt.s32.totalorder %s507_s14, 2 }
   0xf   : > { %s582_s23 = scalar_select %p37_p7, %s495_s11, %s39_s18  }
  0x10   : > { %s707_s22 = scalar_select %p577_p9, 1, 0 }
  0x11   : > { %p584_p11 = por %p110_p10, %p52_p3  ;;  %s137_s25 = sand.u32 1, %s495_s11  }
  0x12   : > { %s320_s26 = sshll.u32 %s137_s25, 3  ;;  %s331_s27 = sshll.u32 %s503_s13, 7 }
  0x13   : > { %s708_s24 = scalar_select %p584_p11, 1, 0 }
  0x14   : > { %s595_s30 = scalar_lea.hbm %s701_s0, %s331_s27  ;;  %s141_s3 = scalar_lea.vmem [#allocation2], %s320_s26 }
  0x15   : > { %s151_s4 = sshll.u32 %s141_s3, 4  ;;  %p601_p0 = pnand %p345_p13, %p567_p4  ;;  %s597_s4 = int_to_ptr.vmem [resolvable:$true] %s151_s4 }
  0x16   : > { %s138_s6 = scalar_lea.sflag [#allocation3], %s137_s25  ;;  %s395_s7 = scalar_lea.hbm %s595_s30, 128 }
  0x17   : > { %p396_p3 = scmp.ne.s32.totalorder %s595_s30, %s395_s7  ;;  %p397_p5 = pneg %p601_p0 }
  0x18   : > { %s400_s16 = scalar_lea.hbm %s701_s0, 256  ;;  %p401_p4 = scmp.lt.u32.totalorder %s595_s30, %s701_s0 }
  0x19   : > { %p398_p6 = pnand %p397_p5, %p396_p3  ;;  %p402_p10 = scmp.lt.u32.totalorder %s400_s16, %s395_s7 }
  0x1a   : > { %p404_p12 = scmp.lt.u32.totalorder %s395_s7, %s595_s30 }
  0x1b   : > { %p399_p7 = pneg %p398_p6  ;;  %p403_p13 = por %p402_p10, %p401_p4 }
  0x1d   : > { %p405_p1 = por %p404_p12, %p403_p13 }
  0x1f   : > { %p406_p2 = pnand %p405_p1, %p399_p7 }
  0x21   : > { %409 = shalt.err (!%p406_p2)
}
  0x22   : > { %s410_s20 = scalar_lea.vmem %s597_s4, 128  ;;  %s509_s25 = smov [#allocation2]  }
  0x23   : > { %p411_p3 = scmp.ne.s32.totalorder %s597_s4, %s410_s20  ;;  %s415_s26 = sshll.u32 %s509_s25, 4  ;;  %s416_s26 = int_to_ptr.vmem [resolvable:$false] %s415_s26 }
  0x24   : > { %s417_s27 = scalar_lea.vmem %s416_s26, 256  ;;  %p418_p9 = scmp.lt.s32.totalorder %s597_s4, %s416_s26 }
  0x25   : > { %p413_p6 = pnand %p411_p3, %p397_p5  ;;  %p419_p4 = scmp.lt.s32.totalorder %s417_s27, %s410_s20 }
  0x27   : > { %p414_p11 = pneg %p413_p6  ;;  %p420_p10 = por %p419_p4, %p418_p9 }
  0x29   : > { %p421_p12 = pnand %p420_p10, %p414_p11 }
  0x2b   : > { %424 = shalt.err (!%p421_p12)
}
  0x2c   : > { %340 = dma.hbm_to_vmem [thread:$0]  (!%p601_p0), %s595_s30, 128, %s597_s4, %s138_s6  }
  0x2d   : > { %p710_p1 = scmp.lt.s32.totalorder %s507_s14, 3  ;;  %p711_p2 = scmp.ge.s32.totalorder %s507_s14, 1 }
  0x2f   : > { %p157_p5 = pnand %p711_p2, %p710_p1 }
  0x30   : > { %s637_s28 = sand.u32 (!%p157_p5), 1, %s491_s10  }
  0x31   : > { %160 = sbr.rel (%p157_p5) target bundleno = 83 (0x53), region = 28  ;;  %s324_s29 = sshll.u32 (!%p157_p5), %s637_s28, 3 }
  0x32   : > { %s163_s3 = scalar_lea.sflag (!%p157_p5), [#allocation3], %s637_s28  ;;  %s166_s7 = scalar_lea.vmem (!%p157_p5), [#allocation2], %s324_s29 }
  0x38   : > { %478 = dma.done.wait (%p573_p8), %s163_s3, 128  }
  0x39   : > { %480 = vsyncadd (%p573_p8), %s163_s3, 4294967168  ;;  %s190_s30 = scalar_lea.vmem [#allocation5], %s324_s29  ;;  %s332_s5 = sshll.u32 %s499_s12, 7  ;;  %v195_v0 = vld [vmem:[%s166_s7] sm:$0xff] }
  0x3a   : > { %s216_s4 = sshll.u32 %s190_s30, 4  ;;  %v196_v1 = vld [vmem:[%s702_s1] sm:$0xff]  ;;  %s654_s21 = scalar_lea.hbm %s703_s2, %s332_s5  ;;  %s649_s4 = int_to_ptr.vmem [resolvable:$true] %s216_s4 }
  0x3b   : > { %v197_v2 = vadd.f32 %v196_v1, %v195_v0  ;;  %s200_s18 = scalar_lea.sflag [#allocation4], %s637_s28  ;;  %s425_s19 = scalar_lea.vmem %s649_s4, 128 }
  0x3c   : > { %p426_p8 = scmp.ne.s32.totalorder %s649_s4, %s425_s19  ;;  %p712_p9 = scmp.ne.s32.totalorder %s707_s22, 0 }
  0x3d   : > { %198 = vst [vmem:[%s190_s30] sm:$0xff] %v197_v2  ;;  %s510_s12 = smov [#allocation5]  }
  0x3e   : > { %p427_p11 = pnand %p426_p8, %p712_p9  ;;  %s429_s20 = sshll.u32 %s510_s12, 4  ;;  %s430_s20 = int_to_ptr.vmem [resolvable:$false] %s429_s20 }
  0x3f   : > { %s431_s25 = scalar_lea.vmem %s430_s20, 256  ;;  %p432_p7 = scmp.lt.s32.totalorder %s649_s4, %s430_s20 }
  0x40   : > { %p428_p0 = pneg %p427_p11  ;;  %p433_p13 = scmp.lt.s32.totalorder %s431_s25, %s425_s19 }
  0x42   : > { %p434_p3 = por %p433_p13, %p432_p7 }
  0x44   : > { %p435_p6 = pnand %p434_p3, %p428_p0 }
  0x46   : > { %438 = shalt.err (!%p435_p6)
}
  0x47   : > { %s439_s26 = scalar_lea.hbm %s654_s21, 128  ;;  %s443_s29 = scalar_lea.hbm %s703_s2, 256 }
  0x48   : > { %p440_p4 = scmp.ne.s32.totalorder %s654_s21, %s439_s26  ;;  %p444_p1 = scmp.lt.u32.totalorder %s654_s21, %s703_s2 }
  0x49   : > { %p445_p2 = scmp.lt.u32.totalorder %s443_s29, %s439_s26  ;;  %p447_p8 = scmp.lt.u32.totalorder %s439_s26, %s654_s21 }
  0x4a   : > { %p441_p10 = pnand %p440_p4, %p712_p9 }
  0x4b   : > { %p446_p5 = por %p445_p2, %p444_p1 }
  0x4c   : > { %p442_p12 = pneg %p441_p10 }
  0x4d   : > { %p448_p11 = por %p447_p8, %p446_p5 }
  0x4f   : > { %p449_p0 = pnand %p448_p11, %p442_p12 }
  0x51   : > { %452 = shalt.err (!%p449_p0)
}
  0x52   : > { %335 = dma.vmem_to_hbm [thread:$0]  (%p712_p9), %s649_s4, 128, %s654_s21, %s200_s18  }
  0x53 PF: > { %s228_s30 = sand.u32 1, %s487_s9   ;;  %p713_p7 = scmp.ne.s32.totalorder %s708_s24, 0 }
  0x54   : > { %p714_p13 = scmp.ge.s32.totalorder %s507_s14, 2  ;;  %s229_s5 = scalar_lea.sflag [#allocation4], %s228_s30 }
  0x56   : > { %p342_p3 = pnand %p714_p13, %p713_p7 }
  0x58   : > { %482 = dma.done.wait (!%p342_p3), %s229_s5, 128  }
  0x59   : > { %484 = vsyncadd (!%p342_p3), %s229_s5, 4294967168  ;;  %s18_s14 = sadd.s32 1, %s507_s14   ;;  %s715_s9 = smov %s491_s10 }
  0x5a   : > { %p15_p6 = scmp.ge.s32.totalorder %s18_s14, 4   ;;  %s716_s10 = smov %s495_s11 }
  0x5b   : > { %s717_s11 = smov %s582_s23  ;;  %s718_s12 = smov %s503_s13 }
  0x5c   : > { %s719_s13 = smov %s721_s17  ;;  %17 = sbr.rel (!%p15_p6) target bundleno = 6 (0x6), region = 76 }
  0x63   :  { %234 = vsyncpa [#allocation3], 1 }
  0x64   :  { %236 = vsyncpa [#allocation3 + $0x1], 1 }
  0x65   :  { %237 = vsyncpa [#allocation4], 1 }
  0x66   :  { %239 = vsyncpa [#allocation4 + $0x1], 1 }

</bundles_post_ra>
